<compile_context>
chip_gen: v7x
topology: tpu7x:2x2x1
jax: 0.10.0
libtpu: 0.0.40
codegen_flags: <defaults>
</compile_context>

<pallas_src>
import functools

import jax
import jax.numpy as jnp
from jax.experimental import pallas as pl
from jax.experimental.pallas import tpu as pltpu


def _round_up(n, m):
    return (n + m - 1) // m * m


def _largest_divisor_tile(n, max_tile):
    """Largest multiple of 128 that divides n (n must be a multiple of 128), <= max_tile."""
    t = max(128, min(max_tile, n) // 128 * 128)
    while n % t:
        t -= 128
    return t


def _vmem_estimate_bytes(seq_len, out_len, tile, itemsize):
    # double-buffered in/out blocks + in-kernel temporaries (A, cast, f32 acc)
    io = 2 * (seq_len + out_len) * tile * itemsize
    tmp = (out_len * seq_len + seq_len * tile + 2 * out_len * tile) * 4
    return io + tmp


def _moving_avg_kernel(x_ref, o_ref, *, kernel_size, stride, pad, seq_len, out_len):
    """x_ref: (L, T) VMEM tile, o_ref: (L_out, T) VMEM tile (T lane-dense)."""
    K = kernel_size
    x = x_ref[...]                                    # input dtype; no f32 copy of the sequence

    # Banded window-count matrix A (out_len, seq_len):
    #   A[t, l] = #{ j in [0, K) : clamp(t*stride - pad + j, 0, L-1) == l }
    # Edge replication and stride are folded into A (no concat / strided gather).
    t_idx = jax.lax.broadcasted_iota(jnp.int32, (out_len, seq_len), 0)
    l_idx = jax.lax.broadcasted_iota(jnp.int32, (out_len, seq_len), 1)
    s = t_idx * stride - pad                          # window start in unpadded coords
    big = K + pad + seq_len                           # sentinel for the clamped edge columns
    lo = jnp.where(l_idx == 0, -big, l_idx)
    hi = jnp.where(l_idx == seq_len - 1, big, l_idx)
    cnt = jnp.clip(jnp.minimum(hi, s + K - 1) - jnp.maximum(lo, s) + 1, 0, K)

    # Integer counts <= K are exact in bf16 for K <= 256; keep the 1/K scale outside the matmul.
    if x.dtype == jnp.float32 or K <= 256:
        a = cnt.astype(x.dtype)
        xm = x
    else:
        a = cnt.astype(jnp.float32)
        xm = x.astype(jnp.float32)

    acc = jnp.dot(a, xm, preferred_element_type=jnp.float32)   # MXU: (out_len, T) f32
    o_ref[...] = (acc * (1.0 / float(K))).astype(o_ref.dtype)


def moving_avg(x, kernel_size, stride, *, max_lane_tile=512):
    """Moving average over the sequence axis of x: (B, L, C) -> (B, L_out, C)."""
    B, L, C = x.shape
    pad = (kernel_size - 1) // 2
    L_out = (L + 2 * pad - kernel_size) // stride + 1
    itemsize = jnp.dtype(x.dtype).itemsize
    budget = 20 * 1024 * 1024  # per-block VMEM estimate target (safe on v5e/v6e/v7x)

    kern = functools.partial(
        _moving_avg_kernel,
        kernel_size=kernel_size, stride=stride, pad=pad, seq_len=L, out_len=L_out)

    # TODO(synk): halo-tile the sequence axis for very long L (whole-L blocks assumed here).

    if C >= 128:
        # ---- natural-layout path: no wrapper-side HBM relayout ----
        if C % 128 == 0:
            tile_c = _largest_divisor_tile(C, max_lane_tile)
            while tile_c > 128 and _vmem_estimate_bytes(L, L_out, tile_c, itemsize) > budget:
                tile_c = _largest_divisor_tile(C, tile_c - 128)
            # guarantee >= 2 grid steps so "parallel" axes can use both v7x TensorCores
            if B * (C // tile_c) < 2 and tile_c % 256 == 0:
                tile_c //= 2
        else:
            tile_c = C  # full-dim last block is allowed even when not a multiple of 128
        est = _vmem_estimate_bytes(L, L_out, tile_c, itemsize)
        vmem_limit = int(min(max(2 * est + (2 << 20), 16 << 20), 48 << 20))
        return pl.pallas_call(
            kern,
            out_shape=jax.ShapeDtypeStruct((B, L_out, C), x.dtype),
            grid=(B, C // tile_c),
            in_specs=[pl.BlockSpec((pl.Squeezed(), L, tile_c), lambda b, c: (b, 0, c))],
            out_specs=pl.BlockSpec((pl.Squeezed(), L_out, tile_c), lambda b, c: (b, 0, c)),
            compiler_params=pltpu.CompilerParams(
                dimension_semantics=("parallel", "parallel"),
                vmem_limit_bytes=vmem_limit),
        )(x)

    # ---- lane-fold path (C < 128): fold batch+channels into the lane axis ----
    N = B * C
    xt = jnp.transpose(x, (1, 0, 2)).reshape(L, N)          # (L, B*C)
    N128 = _round_up(N, 128)
    if N128 != N:
        xt = jnp.pad(xt, ((0, 0), (0, N128 - N)))
    lane_tile = _largest_divisor_tile(N128, max_lane_tile)
    while lane_tile > 128 and _vmem_estimate_bytes(L, L_out, lane_tile, itemsize) > budget:
        lane_tile = _largest_divisor_tile(N128, lane_tile - 128)
    if N128 // lane_tile < 2 and lane_tile > 128:
        lane_tile = _largest_divisor_tile(N128, lane_tile // 2)   # >= 2 steps for megacore
    est = _vmem_estimate_bytes(L, L_out, lane_tile, itemsize)
    vmem_limit = int(min(max(2 * est + (2 << 20), 16 << 20), 48 << 20))
    out2d = pl.pallas_call(
        kern,
        out_shape=jax.ShapeDtypeStruct((L_out, N128), x.dtype),
        grid=(N128 // lane_tile,),
        in_specs=[pl.BlockSpec((L, lane_tile), lambda i: (0, i))],
        out_specs=pl.BlockSpec((L_out, lane_tile), lambda i: (0, i)),
        compiler_params=pltpu.CompilerParams(
            dimension_semantics=("parallel",),
            vmem_limit_bytes=vmem_limit),
    )(xt)
    return out2d[:, :N].reshape(L_out, B, C).transpose(1, 0, 2)


def _reference_moving_avg(x, kernel_size, stride):
    """Pure-JAX reference matching the PyTorch module."""
    pad = (kernel_size - 1) // 2
    front = jnp.repeat(x[:, 0:1, :], pad, axis=1)
    end = jnp.repeat(x[:, -1:, :], pad, axis=1)
    xp = jnp.concatenate([front, x, end], axis=1)
    L_pad = xp.shape[1]
    L_out = (L_pad - kernel_size) // stride + 1
    outs = []
    for t in range(L_out):
        outs.append(jnp.mean(xp[:, t * stride:t * stride + kernel_size, :], axis=1))
    return jnp.stack(outs, axis=1)


if __name__ == "__main__":
    key = jax.random.PRNGKey(0)
    configs = [
        # (B, L, C, kernel_size, stride)
        (2, 16, 8, 5, 1),      # lane-fold path (C < 128), small odd K
        (2, 32, 128, 25, 1),   # natural-layout path, Autoformer default K=25
        (2, 24, 8, 4, 2),      # even kernel + stride > 1
    ]
    for i, (B, L, C, K, s) in enumerate(configs):
        k = jax.random.fold_in(key, i)
        x = jax.random.normal(k, (B, L, C), dtype=jnp.float32)
        out = jax.block_until_ready(moving_avg(x, K, s))
        ref = _reference_moving_avg(x, K, s)
        assert out.shape == ref.shape, (out.shape, ref.shape)
        assert jnp.allclose(out, ref, atol=1e-5, rtol=1e-5), f"mismatch for {(B, L, C, K, s)}"
    print("KERNEL_OK")
</pallas_src>

<mosaic_0001>
module attributes {stable_mosaic.version = 11 : i64} {
  func.func @_moving_avg_kernel(%arg0: i32, %arg1: memref<16x128xf32, #tpu.memory_space<vmem>>, %arg2: memref<16x128xf32, #tpu.memory_space<vmem>>) attributes {dimension_semantics = [#tpu.dimension_semantics<parallel>], iteration_bounds = array<i64: 1>, scalar_prefetch = 0 : i64, scratch_operands = 0 : i64, tpu.core_type = #tpu.core_type<tc>, window_params = [{transform_indices = @transform_0, window_bounds = array<i64: 16, 128>}, {transform_indices = @transform_1, window_bounds = array<i64: 16, 128>}]} {
    %c0 = arith.constant 0 : index
    %c0_0 = arith.constant 0 : index
    %0 = vector.load %arg1[%c0, %c0_0] : memref<16x128xf32, #tpu.memory_space<vmem>>, vector<16x128xf32>
    %1 = tpu.iota {dimensions = array<i32: 0>} : vector<16x16xi32>
    %2 = tpu.iota {dimensions = array<i32: 1>} : vector<16x16xi32>
    %c1_i32 = arith.constant 1 : i32
    %3 = vector.broadcast %c1_i32 : i32 to vector<16x16xi32>
    %4 = arith.muli %1, %3 : vector<16x16xi32>
    %c2_i32 = arith.constant 2 : i32
    %5 = vector.broadcast %c2_i32 : i32 to vector<16x16xi32>
    %6 = arith.subi %4, %5 : vector<16x16xi32>
    %c0_i32 = arith.constant 0 : i32
    %7 = vector.broadcast %c0_i32 : i32 to vector<16x16xi32>
    %8 = arith.cmpi eq, %2, %7 : vector<16x16xi32>
    %c-23_i32 = arith.constant -23 : i32
    %9 = vector.broadcast %c-23_i32 : i32 to vector<16x16xi32>
    %10 = arith.select %8, %9, %2 : vector<16x16xi1>, vector<16x16xi32>
    %c15_i32 = arith.constant 15 : i32
    %11 = vector.broadcast %c15_i32 : i32 to vector<16x16xi32>
    %12 = arith.cmpi eq, %2, %11 : vector<16x16xi32>
    %c23_i32 = arith.constant 23 : i32
    %13 = vector.broadcast %c23_i32 : i32 to vector<16x16xi32>
    %14 = arith.select %12, %13, %2 : vector<16x16xi1>, vector<16x16xi32>
    %c5_i32 = arith.constant 5 : i32
    %15 = vector.broadcast %c5_i32 : i32 to vector<16x16xi32>
    %16 = arith.addi %6, %15 : vector<16x16xi32>
    %c1_i32_1 = arith.constant 1 : i32
    %17 = vector.broadcast %c1_i32_1 : i32 to vector<16x16xi32>
    %18 = arith.subi %16, %17 : vector<16x16xi32>
    %19 = arith.minsi %14, %18 : vector<16x16xi32>
    %20 = arith.maxsi %10, %6 : vector<16x16xi32>
    %21 = arith.subi %19, %20 : vector<16x16xi32>
    %c1_i32_2 = arith.constant 1 : i32
    %22 = vector.broadcast %c1_i32_2 : i32 to vector<16x16xi32>
    %23 = arith.addi %21, %22 : vector<16x16xi32>
    %c0_i32_3 = arith.constant 0 : i32
    %c5_i32_4 = arith.constant 5 : i32
    %24 = vector.broadcast %c0_i32_3 : i32 to vector<16x16xi32>
    %25 = arith.maxsi %24, %23 : vector<16x16xi32>
    %26 = vector.broadcast %c5_i32_4 : i32 to vector<16x16xi32>
    %27 = arith.minsi %26, %25 : vector<16x16xi32>
    %28 = arith.sitofp %27 : vector<16x16xi32> to vector<16x16xf32>
    %cst = arith.constant dense<0.000000e+00> : vector<16x128xf32>
    %29 = tpu.matmul %28, %0, %cst {dimension_numbers = #tpu.dot_dimension_numbers<[1], [0], [0], [1], [0, 0, 1, 1], [], []>} : vector<16x16xf32>, vector<16x128xf32>, vector<16x128xf32> -> vector<16x128xf32>
    %cst_5 = arith.constant 2.000000e-01 : f32
    %30 = vector.broadcast %cst_5 : f32 to vector<16x128xf32>
    %31 = arith.mulf %29, %30 : vector<16x128xf32>
    %c0_6 = arith.constant 0 : index
    %c0_7 = arith.constant 0 : index
    %32 = vector.load %arg2[%c0_6, %c0_7] : memref<16x128xf32, #tpu.memory_space<vmem>>, vector<16x128xf32>
    tpu.vector_store %arg2[%c0_6, %c0_7], %31 {strides = array<i32>} : memref<16x128xf32, #tpu.memory_space<vmem>>, vector<16x128xf32>,
    return
  }
  func.func @transform_0(%arg0: i32) -> (i32, i32) {
    %c0_i32 = arith.constant 0 : i32
    %c0_i32_0 = arith.constant 0 : i32
    return %c0_i32, %arg0 : i32, i32
  }
  func.func @transform_1(%arg0: i32) -> (i32, i32) {
    %c0_i32 = arith.constant 0 : i32
    %c0_i32_0 = arith.constant 0 : i32
    return %c0_i32, %arg0 : i32, i32
  }
}

</mosaic_0001>

<bundles_post_ra>
// kernel: tpu_custom_call.1
= control target key start
LH: loop header
LB: loop body
LE: loop exit
PB: predicated region body
PF: predicated region fallthrough
CT: control target
= control target key end

     0   :  { %6 = vsyncpa [#allocation3], 0  ;;  %s282_s0 = inlined_call_operand.hbm [shape: f32[16,128], index: 0, kind: input, shape index: {}]   ;;  %s283_s1 = inlined_call_operand.hbm [shape: f32[16,128], index: 1, kind: output, shape index: {}]  }
   0x1   :  { %7 = vsyncpa [#allocation4], 0  ;;  %s238_s6 = smov [#allocation2]   ;;  %s190_s10 = scalar_lea.hbm %s282_s0, 256 }
   0x2   :  { %s13_s7 = sshll.u32 %s238_s6, 4  ;;  %p191_p0 = scmp.ne.s32.totalorder %s282_s0, %s190_s10  ;;  %s14_s7 = int_to_ptr.vmem [resolvable:$true] %s13_s7 }
   0x3   :  { %p194_p1 = scmp.lt.u32.totalorder %s190_s10, %s282_s0 }
   0x5   :  { %p196_p2 = pnand %p194_p1, %p191_p0 }
   0x7   :  { %199 = shalt.err (!%p196_p2)
}
   0x8   :  { %s200_s15 = scalar_lea.vmem %s14_s7, 256  ;;  %p205_p4 = scmp.lt.s32.totalorder %s14_s7, %s14_s7 }
   0x9   :  { %p201_p3 = scmp.ne.s32.totalorder %s14_s7, %s200_s15  ;;  %p206_p5 = scmp.lt.s32.totalorder %s200_s15, %s200_s15 }
   0xb   :  { %p207_p6 = por %p206_p5, %p205_p4 }
   0xd   :  { %p208_p7 = pnand %p207_p6, %p201_p3 }
   0xf   :  { %211 = shalt.err (!%p208_p7)
}
  0x10   :  { %s239_s16 = smov 128   ;;  %s240_s17 = smov 8  }
  0x11   :  { %19 = dma.hbm_to_vmem [thread:$0]  %s282_s0, 256, %s14_s7, [#allocation3], %s239_s16, %s239_s16, %s240_s17  }
  0x12   :  { %234 = dma.done.wait [#allocation3], 256  }
  0x13   :  { %235 = vsyncadd [#allocation3], 4294967040  ;;  %v25_v0 = vlaneseq  ;;  %v23_v8 = vld [vmem:[#allocation2] sm:$0xff]  ;;  %v24_v9 = vld [vmem:[#allocation2 + $0x8] sm:$0xff]  ;;  %vm62_vm9 = vcmask 130048   ;;  %s241_s0 = smov [#allocation5]  }
  0x14   :  { %v182_v11 = vpack.c.bf16 %v24_v9, %v23_v8  ;;  %s153_s20 = sshll.u32 %s241_s0, 4  ;;  %s154_s20 = int_to_ptr.vmem [resolvable:$true] %s153_s20 }
  0x15   :  { %v26_v1 = vshrl.u32 %v25_v0, 7  ;;  %v29_v2 = vand.u32 127, %v25_v0  ;;  %s212_s21 = scalar_lea.vmem %s154_s20, 256  ;;  %p217_p9 = scmp.lt.s32.totalorder %s154_s20, %s154_s20 }
  0x16   :  { %183 = vmatprep.subr.bf16.mxu0 %v182_v11  ;;  %p213_p8 = scmp.ne.s32.totalorder %s154_s20, %s212_s21  ;;  %p218_p10 = scmp.lt.s32.totalorder %s212_s21, %s212_s21 }
  0x17   :  { %v27_v3 = vadd.s32 8, %v26_v1  ;;  %v165_v4 = vadd.s32 4294967294, %v26_v1  ;;  %vm32_vm0 = vcmp.eq.s32.totalorder %v29_v2, 0  ;;  %vm34_vm1 = vcmp.eq.s32.totalorder %v29_v2, 15  ;;  %185 = vmatpush3.bf16.msra.mxu0 %v182_v11 }
  0x18   :  { %v33_v5 = vsel %vm32_vm0, 4294967273, %v29_v2  ;;  %v35_v10 = vsel %vm34_vm1, 23, %v29_v2  ;;  %p219_p11 = por %p218_p10, %p217_p9 }
  0x19   :  { %v166_v6 = vadd.s32 4294967294, %v27_v3  ;;  %v36_v7 = vadd.s32 5, %v165_v4  ;;  %vm44_vm2 = vcmp.gt.s32.totalorder %v33_v5, %v165_v4 }
  0x1a   :  { %v45_v14 = vsel %vm44_vm2, %v33_v5, %v165_v4  ;;  %p220_p12 = pnand %p219_p11, %p213_p8 }
  0x1b   :  { %v37_v12 = vadd.s32 5, %v166_v6  ;;  %v167_v13 = vadd.s32 4294967295, %v36_v7  ;;  %vm46_vm3 = vcmp.gt.s32.totalorder %v33_v5, %v166_v6 }
  0x1c   :  { %v47_v17 = vsel %vm46_vm3, %v33_v5, %v166_v6 }
  0x1d   :  { %v168_v15 = vadd.s32 4294967295, %v37_v12  ;;  %vm40_vm4 = vcmp.lt.s32.totalorder %v35_v10, %v167_v13 }
  0x1e   :  { %v41_v16 = vsel %vm40_vm4, %v35_v10, %v167_v13 }
  0x1f   :  { %vm42_vm5 = vcmp.lt.s32.totalorder %v35_v10, %v168_v15  ;;  %v48_v18 = vsub.s32 %v41_v16, %v45_v14 }
  0x20   :  { %v43_v19 = vsel %vm42_vm5, %v35_v10, %v168_v15 }
  0x21   :  { %v50_v20 = vadd.s32 1, %v48_v18  ;;  %v49_v21 = vsub.s32 %v43_v19, %v47_v17 }
  0x23   :  { %vm52_vm6 = vcmp.gt.s32.totalorder %v50_v20, 0  ;;  %v51_v22 = vadd.s32 1, %v49_v21 }
  0x24   :  { %v53_v23 = vsel %vm52_vm6, %v50_v20, 0 }
  0x25   :  { %vm56_vm7 = vcmp.lt.s32.totalorder %v53_v23, 5  ;;  %vm54_vm8 = vcmp.gt.s32.totalorder %v51_v22, 0 }
  0x26   :  { %v57_v24 = vsel %vm56_vm7, %v53_v23, 5  ;;  %v55_v25 = vsel %vm54_vm8, %v51_v22, 0 }
  0x27   :  { %v60_v26 = vcvt.s32.f32 %v57_v24  ;;  %vm58_vm10 = vcmp.lt.s32.totalorder %v55_v25, 5 }
  0x28   :  { %v59_v27 = vsel %vm58_vm10, %v55_v25, 5 }
  0x29   :  { %179 = vmatprep.mubr.msk.f32.mxu0 %vm62_vm9, %v60_v26  ;;  %v61_v28 = vcvt.s32.f32 %v59_v27 }
  0x2b   :  { %180 = vmatmul.mubr.msk.f32.vlgmr.msra.gmra.mrb[0].mxu0 %vm62_vm9, %v61_v28 }
  0xfe   :  { %v181_v29 = vpop.f32.mrb[0].mxu0 }
  0xff   :  { %v145_v30 = vmul.f32 0.2, %v181_v29  ;;  %v135_v31 = vpop.f32.mrb[1].mxu0 }
 0x100   :  { %v144_v32 = vmul.f32 0.2, %v135_v31 }
 0x101   :  { %147 = vst [vmem:[#allocation5 + $0x8] sm:$0xff] %v145_v30 }
 0x102   :  { %146 = vst [vmem:[#allocation5] sm:$0xff] %v144_v32 }
 0x103   :  { %223 = shalt.err (!%p220_p12)
}
 0x104   :  { %s224_s24 = scalar_lea.hbm %s283_s1, 256 }
 0x105   :  { %p225_p13 = scmp.ne.s32.totalorder %s283_s1, %s224_s24  ;;  %p228_p0 = scmp.lt.u32.totalorder %s224_s24, %s283_s1 }
 0x107   :  { %p230_p1 = pnand %p228_p0, %p225_p13 }
 0x109   :  { %233 = shalt.err (!%p230_p1)
}
 0x10a   :  { %159 = dma.vmem_to_hbm [thread:$0]  %s154_s20, 256, %s283_s1, [#allocation4], %s239_s16, %s239_s16, %s240_s17  }
 0x10b   :  { %236 = dma.done.wait [#allocation4], 256  }
 0x10c   :  { %237 = vsyncadd [#allocation4], 4294967040 }
 0x10d   :  { %163 = vsyncpa [#allocation3], 1 }
 0x10e   :  { %164 = vsyncpa [#allocation4], 1 }

</bundles_post_ra>
